<compile_context>
chip_gen: v5e
topology: v5e:2x2
jax: 0.10.0
libtpu: 0.0.40
codegen_flags: <defaults>
</compile_context>

<pallas_src>
import functools

import jax
import jax.numpy as jnp
from jax.experimental import pallas as pl
from jax.experimental.pallas import tpu as pltpu


def _round_up(x, m):
    return ((x + m - 1) // m) * m


def _cdiv(a, b):
    return (a + b - 1) // b


def _weighted_row_norm(st_ref, w_ref, d_dim, tile_n, n_valid):
    """Masked, weighted L2 norm over the stacked sublane axis -> (1, tile_n).

    st_ref: (2*D, tile_n) block, rows [0, D) = pred, rows [D, 2D) = target.
    w_ref : (1, tile_n) block (original dtype, cast here).
    Lanes at global index >= n_valid (ragged boundary block) are forced to 0
    BEFORE any accumulation, so garbage boundary reads never propagate.
    """
    x = st_ref[...].astype(jnp.float32)                       # (2D, TN)
    diff = x[:d_dim, :] - x[d_dim:, :]                        # (D, TN)  VPU
    ssq = jnp.sum(diff * diff, axis=0, keepdims=True)         # (1, TN)  XLU sublane reduce
    w = w_ref[...].astype(jnp.float32)                        # (1, TN)
    lane = jax.lax.broadcasted_iota(jnp.int32, (1, tile_n), 1)
    valid = (pl.program_id(0) * tile_n + lane) < n_valid
    return jnp.where(valid, jnp.sqrt(ssq) * w, 0.0)           # (1, TN)


def _make_rowloss_kernel(d_dim, tile_n, n_valid):
    """reduction == 'none': write the lane-dense per-row weighted loss."""
    def kernel(st_ref, w_ref, loss_ref):
        row = _weighted_row_norm(st_ref, w_ref, d_dim, tile_n, n_valid)
        loss_ref[...] = row.astype(loss_ref.dtype)
    return kernel


def _make_partial_kernel(d_dim, tile_n, n_valid):
    """reduction in ('mean', 'sum'): emit one (1, 128) lane-partial per tile."""
    n_groups = tile_n // 128

    def kernel(st_ref, w_ref, part_ref):
        row = _weighted_row_norm(st_ref, w_ref, d_dim, tile_n, n_valid)
        # Fold tile_n lanes into one 128-lane partial with aligned VALU adds.
        acc = row[:, 0:128]
        for g in range(1, n_groups):
            acc = acc + row[:, g * 128:(g + 1) * 128]
        part_ref[...] = acc                                    # (1, 128)
    return kernel


@functools.partial(jax.jit,
                   static_argnames=("reduction", "loss_weight", "max_tile_n"))
def dist_loss_forward(pred, target, weight, avg_factor=None,
                      reduction="mean", loss_weight=1.0, max_tile_n=32768):
    """DistLoss forward.  pred/target: (N, D); weight: (N, 1) or (N,)."""
    if reduction not in ("none", "mean", "sum"):
        raise ValueError(f"invalid reduction: {reduction}")
    if avg_factor is not None and reduction == "sum":
        # Matches mmdet.weight_reduce_loss.
        raise ValueError('avg_factor can not be used with reduction="sum"')

    N, D = pred.shape

    # Single producer fusion: transpose + stack into one lane-dense (2D, N)
    # operand.  For D=4 f32 this exactly fills the (8, 128) VMEM tile.
    stacked = jnp.concatenate([jnp.transpose(pred), jnp.transpose(target)],
                              axis=0)                          # (2D, N)
    w_row = jnp.reshape(weight, (1, N))                        # original dtype

    # Balanced lane tiling.  Ragged tail is masked inside the kernel.
    n_lane = _round_up(N, 128)
    num_tiles = _cdiv(n_lane, int(max_tile_n))
    if num_tiles == 1 and n_lane >= 8192:
        num_tiles = 2                     # keep both v7x TensorCores busy
    tile_n = _round_up(_cdiv(n_lane, num_tiles), 128)
    num_tiles = _cdiv(n_lane, tile_n)

    in_specs = [
        pl.BlockSpec((2 * D, tile_n), lambda i: (0, i)),
        pl.BlockSpec((1, tile_n), lambda i: (0, i)),
    ]
    cparams = pltpu.CompilerParams(dimension_semantics=("parallel",))

    if reduction == "none":
        loss_row = pl.pallas_call(
            _make_rowloss_kernel(D, tile_n, N),
            out_shape=jax.ShapeDtypeStruct((1, N), pred.dtype),
            grid_spec=pltpu.PrefetchScalarGridSpec(
                num_scalar_prefetch=0,
                grid=(num_tiles,),
                in_specs=in_specs,
                out_specs=pl.BlockSpec((1, tile_n), lambda i: (0, i)),
            ),
            compiler_params=cparams,
        )(stacked, w_row)
        loss = jnp.transpose(loss_row)                         # (N, 1)
        return (loss_weight * loss).astype(pred.dtype)

    # 'mean' / 'sum': only per-tile (1, 128) lane-partials leave the kernel.
    partials = pl.pallas_call(
        _make_partial_kernel(D, tile_n, N),
        out_shape=jax.ShapeDtypeStruct((1, num_tiles * 128), jnp.float32),
        grid_spec=pltpu.PrefetchScalarGridSpec(
            num_scalar_prefetch=0,
            grid=(num_tiles,),
            in_specs=in_specs,
            out_specs=pl.BlockSpec((1, 128), lambda i: (0, i)),
        ),
        compiler_params=cparams,
    )(stacked, w_row)
    total = jnp.sum(partials)                                  # tiny XLA epilogue

    eps = jnp.finfo(jnp.float32).eps
    if reduction == "mean":
        if avg_factor is not None:
            out = total / (avg_factor + eps)
        else:
            out = total / N
    else:  # 'sum'
        out = total
    return (loss_weight * out).astype(pred.dtype)


if __name__ == "__main__":
    key = jax.random.PRNGKey(0)
    k1, k2, k3, k4, k5, k6 = jax.random.split(key, 6)
    eps = jnp.finfo(jnp.float32).eps

    # ---- Small, detection-like shape; N not a multiple of 128 (ragged tail).
    N, D = 200, 4
    pred = jax.random.normal(k1, (N, D), dtype=jnp.float32)
    target = jax.random.normal(k2, (N, D), dtype=jnp.float32)
    weight = jax.random.uniform(k3, (N, 1), dtype=jnp.float32)
    avg_factor = 100.0

    ref_row = jnp.sqrt(jnp.sum((pred - target) ** 2, axis=-1, keepdims=True)) * weight

    out_mean = jax.block_until_ready(
        dist_loss_forward(pred, target, weight, avg_factor, reduction="mean"))
    ref_mean = jnp.sum(ref_row) / (avg_factor + eps)
    assert jnp.allclose(out_mean, ref_mean, rtol=1e-5, atol=1e-5), (out_mean, ref_mean)

    out_mean_noaf = jax.block_until_ready(
        dist_loss_forward(pred, target, weight, None, reduction="mean"))
    ref_mean_noaf = jnp.mean(ref_row)
    assert jnp.allclose(out_mean_noaf, ref_mean_noaf, rtol=1e-5, atol=1e-5)

    out_sum = jax.block_until_ready(
        dist_loss_forward(pred, target, weight, None, reduction="sum"))
    ref_sum = jnp.sum(ref_row)
    assert jnp.allclose(out_sum, ref_sum, rtol=1e-5, atol=1e-5), (out_sum, ref_sum)

    out_none = jax.block_until_ready(
        dist_loss_forward(pred, target, weight, None, reduction="none"))
    assert out_none.shape == (N, 1) and out_none.dtype == pred.dtype
    assert jnp.allclose(out_none, ref_row, rtol=1e-5, atol=1e-5)

    # ---- Larger N: exercises multi-tile grid, the >=2-tile split, the
    #      in-kernel boundary mask, and the lane-partial fold.
    N2 = 9000
    pred2 = jax.random.normal(k4, (N2, D), dtype=jnp.float32)
    target2 = jax.random.normal(k5, (N2, D), dtype=jnp.float32)
    weight2 = jax.random.uniform(k6, (N2, 1), dtype=jnp.float32)
    ref_row2 = jnp.sqrt(jnp.sum((pred2 - target2) ** 2, axis=-1, keepdims=True)) * weight2

    out_mean2 = jax.block_until_ready(
        dist_loss_forward(pred2, target2, weight2, 4096.0, reduction="mean"))
    ref_mean2 = jnp.sum(ref_row2) / (4096.0 + eps)
    assert jnp.allclose(out_mean2, ref_mean2, rtol=1e-4, atol=1e-4), (out_mean2, ref_mean2)

    out_none2 = jax.block_until_ready(
        dist_loss_forward(pred2, target2, weight2, None, reduction="none"))
    assert out_none2.shape == (N2, 1)
    assert jnp.allclose(out_none2, ref_row2, rtol=1e-5, atol=1e-5)

    print("KERNEL_OK")
</pallas_src>

<mosaic_0001>
module attributes {stable_mosaic.version = 11 : i64} {
  func.func @kernel(%arg0: i32, %arg1: memref<8x256xf32, #tpu.memory_space<vmem>>, %arg2: memref<1x256xf32, #tpu.memory_space<vmem>>, %arg3: memref<1x128xf32, #tpu.memory_space<vmem>>) attributes {dimension_semantics = [#tpu.dimension_semantics<parallel>], iteration_bounds = array<i64: 1>, scalar_prefetch = 0 : i64, scratch_operands = 0 : i64, tpu.core_type = #tpu.core_type<tc>, window_params = [{transform_indices = @transform_0, window_bounds = array<i64: 8, 256>}, {transform_indices = @transform_1, window_bounds = array<i64: 1, 256>}, {transform_indices = @transform_2, window_bounds = array<i64: 1, 128>}]} {
    %c0 = arith.constant 0 : index
    %c0_0 = arith.constant 0 : index
    %0 = vector.load %arg1[%c0, %c0_0] : memref<8x256xf32, #tpu.memory_space<vmem>>, vector<8x256xf32>
    %1 = vector.extract_strided_slice %0 {offsets = [0, 0], sizes = [4, 256], strides = [1, 1]} : vector<8x256xf32> to vector<4x256xf32>
    %2 = vector.extract_strided_slice %0 {offsets = [4, 0], sizes = [4, 256], strides = [1, 1]} : vector<8x256xf32> to vector<4x256xf32>
    %3 = arith.subf %1, %2 : vector<4x256xf32>
    %4 = arith.mulf %3, %3 : vector<4x256xf32>
    %cst = arith.constant dense<0.000000e+00> : vector<256xf32>
    %5 = vector.multi_reduction <add>, %4, %cst [0] : vector<4x256xf32> to vector<256xf32>
    %6 = vector.shape_cast %5 : vector<256xf32> to vector<1x256xf32>
    %c0_1 = arith.constant 0 : index
    %c0_2 = arith.constant 0 : index
    %7 = vector.load %arg2[%c0_1, %c0_2] : memref<1x256xf32, #tpu.memory_space<vmem>>, vector<1x256xf32>
    %8 = tpu.iota {dimensions = array<i32: 1>} : vector<1x256xi32>
    %c256_i32 = arith.constant 256 : i32
    %9 = arith.muli %arg0, %c256_i32 : i32
    %10 = vector.broadcast %9 : i32 to vector<1x256xi32>
    %11 = arith.addi %10, %8 : vector<1x256xi32>
    %c200_i32 = arith.constant 200 : i32
    %12 = vector.broadcast %c200_i32 : i32 to vector<1x256xi32>
    %13 = arith.cmpi slt, %11, %12 : vector<1x256xi32>
    %14 = math.sqrt %6 : vector<1x256xf32>
    %15 = arith.mulf %14, %7 : vector<1x256xf32>
    %cst_3 = arith.constant 0.000000e+00 : f32
    %16 = vector.broadcast %cst_3 : f32 to vector<1x256xf32>
    %17 = arith.select %13, %15, %16 : vector<1x256xi1>, vector<1x256xf32>
    %18 = vector.extract_strided_slice %17 {offsets = [0, 0], sizes = [1, 128], strides = [1, 1]} : vector<1x256xf32> to vector<1x128xf32>
    %19 = vector.extract_strided_slice %17 {offsets = [0, 128], sizes = [1, 128], strides = [1, 1]} : vector<1x256xf32> to vector<1x128xf32>
    %20 = arith.addf %18, %19 : vector<1x128xf32>
    %c0_4 = arith.constant 0 : index
    %c0_5 = arith.constant 0 : index
    %21 = vector.load %arg3[%c0_4, %c0_5] : memref<1x128xf32, #tpu.memory_space<vmem>>, vector<1x128xf32>
    tpu.vector_store %arg3[%c0_4, %c0_5], %20 {strides = array<i32>} : memref<1x128xf32, #tpu.memory_space<vmem>>, vector<1x128xf32>,
    return
  }
  func.func @transform_0(%arg0: i32) -> (i32, i32) {
    %c0_i32 = arith.constant 0 : i32
    %c0_i32_0 = arith.constant 0 : i32
    return %c0_i32, %arg0 : i32, i32
  }
  func.func @transform_1(%arg0: i32) -> (i32, i32) {
    %c0_i32 = arith.constant 0 : i32
    %c0_i32_0 = arith.constant 0 : i32
    return %c0_i32, %arg0 : i32, i32
  }
  func.func @transform_2(%arg0: i32) -> (i32, i32) {
    %c0_i32 = arith.constant 0 : i32
    %c0_i32_0 = arith.constant 0 : i32
    return %c0_i32, %arg0 : i32, i32
  }
}

</mosaic_0001>

<bundles_post_ra>
// kernel: dist_loss_forward.1
= control target key start
LH: loop header
LB: loop body
LE: loop exit
PB: predicated region body
PF: predicated region fallthrough
CT: control target
= control target key end

     0   :  { %vm23_vm0 = vcmask 1043456   ;;  %v39_v24 = vlaneseq  ;;  %s118_s0 = inlined_call_operand.vmem [shape: f32[8,200], index: 0, kind: input, shape index: {}]   ;;  %s119_s1 = inlined_call_operand.vmem [shape: f32[1,200], index: 1, kind: input, shape index: {}]   ;;  %s120_s2 = inlined_call_operand.vmem [shape: f32[1,128], index: 2, kind: output, shape index: {}]  }
   0x1   :  { %v11_v0 = vld [vmem:[%s118_s0] sm:$0xff]  ;;  %v12_v1 = vld [vmem:[%s118_s0 + $0x8] sm:$0xff] }
   0x2   :  { %v15_v2 = vrot.slane %v11_v0, 4  ;;  %v16_v3 = vrot.slane %v12_v1, 4  ;;  %v40_v29 = vand.u32 127, %v39_v24  ;;  %v38_v32 = vld [vmem:[%s119_s1] sm:$0x3] }
   0x3   :  { %v73_v39 = vperm.slane %v38_v32, 0  ;;  %v74_v43 = vperm.slane %v38_v32, 1 }
   0x4   :  { %v19_v4 = vsub.f32 %v11_v0, %v15_v2  ;;  %v20_v5 = vsub.f32 %v12_v1, %v16_v3  ;;  %v41_v35 = vadd.s32 128, %v40_v29 }
   0x6   :  { %v21_v6 = vmul.f32 %v19_v4, %v19_v4  ;;  %v22_v7 = vmul.f32 %v20_v5, %v20_v5  ;;  %vm47_vm5 = vcmp.lt.s32.totalorder %v41_v35, 200 }
   0x8   :  { %v24_v8 = vsel %vm23_vm0, %v21_v6, 0.0  ;;  %v31_v9 = vsel %vm23_vm0, %v22_v7, 0.0 }
   0x9   :  { %v25_v10 = vrot.slane %v24_v8, 4  ;;  %v32_v11 = vrot.slane %v31_v9, 4 }
   0xb   :  { %v26_v12 = vadd.f32 %v25_v10, %v24_v8  ;;  %v33_v13 = vadd.f32 %v32_v11, %v31_v9 }
   0xd   :  { %v27_v14 = vrot.slane %v26_v12, 2  ;;  %v34_v15 = vrot.slane %v33_v13, 2 }
   0xf   :  { %v28_v16 = vadd.f32 %v27_v14, %v26_v12  ;;  %v35_v17 = vadd.f32 %v34_v15, %v33_v13 }
  0x11   :  { %v29_v18 = vrot.slane %v28_v16, 1  ;;  %v36_v19 = vrot.slane %v35_v17, 1 }
  0x13   :  { %v30_v20 = vadd.f32 %v29_v18, %v28_v16  ;;  %v37_v21 = vadd.f32 %v36_v19, %v35_v17 }
  0x15   :  { %87 = vrsqrt.f32 %v30_v20  ;;  %vm55_vm1 = vcmp.eq.f32.partialorder %v30_v20, inf  ;;  %v58_v37 = vand.u32 2147483648, %v30_v20  ;;  %vm57_vm2 = vcmp.eq.f32.partialorder %v30_v20, 0.0 }
  0x16   :  { %89 = vrsqrt.f32 %v37_v21  ;;  %vm67_vm3 = vcmp.eq.f32.partialorder %v37_v21, inf  ;;  %v70_v41 = vand.u32 2147483648, %v37_v21  ;;  %vm69_vm4 = vcmp.eq.f32.partialorder %v37_v21, 0.0 }
  0x1b   :  { %v88_v22 = vpop.eup %87 }
  0x1c   :  { %v90_v23 = vpop.eup %89  ;;  %v49_v25 = vmul.f32 %v88_v22, %v30_v20 }
  0x1d   :  { %v61_v26 = vmul.f32 %v90_v23, %v37_v21 }
  0x1e   :  { %v50_v27 = vmul.f32 %v88_v22, %v49_v25 }
  0x1f   :  { %v62_v28 = vmul.f32 %v90_v23, %v61_v26 }
  0x20   :  { %v51_v30 = vmul.f32 0.5, %v50_v27 }
  0x21   :  { %v63_v31 = vmul.f32 0.5, %v62_v28 }
  0x22   :  { %v52_v33 = vsub.f32 1.5, %v51_v30 }
  0x23   :  { %v64_v34 = vsub.f32 1.5, %v63_v31 }
  0x24   :  { %v53_v36 = vmul.f32 %v88_v22, %v52_v33 }
  0x25   :  { %v65_v38 = vmul.f32 %v90_v23, %v64_v34 }
  0x26   :  { %v54_v40 = vmul.f32 %v53_v36, %v30_v20 }
  0x27   :  { %v66_v42 = vmul.f32 %v65_v38, %v37_v21 }
  0x28   :  { %v56_v44 = vsel %vm55_vm1, %v30_v20, %v54_v40 }
  0x29   :  { %v59_v45 = vsel %vm57_vm2, %v58_v37, %v56_v44  ;;  %v68_v46 = vsel %vm67_vm3, %v37_v21, %v66_v42 }
  0x2a   :  { %v71_v47 = vsel %vm69_vm4, %v70_v41, %v68_v46  ;;  %v77_v48 = vmul.f32 %v73_v39, %v59_v45 }
  0x2b   :  { %v78_v49 = vmul.f32 %v74_v43, %v71_v47 }
  0x2d   :  { %v80_v50 = vsel %vm47_vm5, %v78_v49, 0.0 }
  0x2e   :  { %v81_v51 = vadd.f32 %v80_v50, %v77_v48 }
  0x30   :  { %82 = vst [vmem:[%s120_s2] sm:$0x1] %v81_v51 }

</bundles_post_ra>
